<compile_context>
chip_gen: v6e
topology: v6e:2x2x1
jax: 0.10.0
libtpu: 0.0.40
codegen_flags: <defaults>
</compile_context>

<pallas_src>
import functools

import jax
import jax.numpy as jnp
from jax.experimental import pallas as pl
from jax.experimental.pallas import tpu as pltpu


def _ce_ls_kernel(logits_ref, labels_ref, out_ref, *,
                  eta: float, n_total: int, n_classes: int):
    x = logits_ref[...]                                   # [tile_n, c_pad], native dtype
    tn, c_pad = x.shape

    # Row max + exp stay in the input dtype (bf16 on v6e/v7x); reductions
    # accumulate in f32.
    m = jnp.max(x, axis=-1, keepdims=True)                               # [tn, 1]
    e = jnp.exp(x - m)                                                   # [tn, c_pad]
    s = jnp.sum(e, axis=-1, keepdims=True, dtype=jnp.float32)            # [tn, 1] f32
    lse = m.astype(jnp.float32) + jnp.log(s)                             # [tn, 1] f32

    labels = labels_ref[...]                                             # [tn, 1] int32
    class_ids = jax.lax.broadcasted_iota(jnp.int32, (tn, c_pad), 1)

    # Logit at the true label via masked lane-sum (no gather / one-hot matmul).
    x_lab = jnp.sum(jnp.where(class_ids == labels, x, 0),
                    axis=-1, keepdims=True, dtype=jnp.float32)           # [tn, 1]

    # Sum of the raw logits over the REAL classes.  Padded lanes hold a large
    # negative sentinel, so mask them out of this sum only (static branch).
    if c_pad != n_classes:
        x_for_sum = jnp.where(class_ids < n_classes, x, 0)
    else:
        x_for_sum = x
    sum_x = jnp.sum(x_for_sum, axis=-1, keepdims=True, dtype=jnp.float32)  # [tn, 1]

    # loss_row = -(1-eta)*log_p[label] - (eta/C)*sum_c log_p_c
    #          = lse - (1-eta)*x[label] - (eta/C)*sum_x
    per_row = lse - (1.0 - eta) * x_lab - (eta / n_classes) * sum_x       # [tn, 1]

    # Zero out padded rows of a ragged tail tile, then emit the per-tile sum.
    row_ids = (pl.program_id(0) * tn
               + jax.lax.broadcasted_iota(jnp.int32, (tn, 1), 0))
    per_row = jnp.where(row_ids < n_total, per_row, 0.0)

    out_ref[0, 0] = jnp.sum(per_row)


def _pick_tile_n(n: int, c_pad: int, in_itemsize: int) -> int:
    # Budget by the full in-kernel working set, not just the HBM tile:
    #   2 * in_itemsize : double-buffered input tile (BlockSpec pipelining)
    #   ~20 bytes       : elementwise temporaries (x-m, exp, int32 iota,
    #                     selects) counted conservatively as ~5 f32-ish passes.
    bytes_per_elem = 2 * in_itemsize + 20
    budget = 24 * 1024 * 1024            # working-set target; vmem_limit = 48 MiB
    t = budget // (c_pad * bytes_per_elem)
    pack = 32 // in_itemsize             # sublane pack: 8 f32 / 16 bf16 / 32 int8
    t = max(pack, (t // pack) * pack)
    # A single tile equal to the full batch is always a legal block shape.
    return n if n <= t else t


def cross_entropy_loss_ls(y_pred: jax.Array, y_true: jax.Array,
                          eta: float = 0.1) -> jax.Array:
    """y_pred: [N, C] float (f32 or bf16), y_true: [N] int -> scalar loss (f32)."""
    n, c = y_pred.shape

    # Very small class counts leave most of each 128-lane vreg / DMA row idle;
    # pad them up to 128 with a huge negative sentinel (softmax-neutral).
    c_pad = c
    if c < 128:
        c_pad = 128
        y_pred = jnp.pad(y_pred, ((0, 0), (0, c_pad - c)),
                         constant_values=-1e30)

    itemsize = jnp.dtype(y_pred.dtype).itemsize
    tile_n = _pick_tile_n(n, c_pad, itemsize)
    num_tiles = pl.cdiv(n, tile_n)
    labels_2d = y_true.astype(jnp.int32).reshape(n, 1)

    partial = pl.pallas_call(
        functools.partial(_ce_ls_kernel, eta=float(eta), n_total=n, n_classes=c),
        out_shape=jax.ShapeDtypeStruct((num_tiles, 1), jnp.float32),
        grid=(num_tiles,),
        in_specs=[
            pl.BlockSpec((tile_n, c_pad), lambda i: (i, 0)),
            pl.BlockSpec((tile_n, 1), lambda i: (i, 0)),
        ],
        out_specs=pl.BlockSpec((1, 1), lambda i: (i, 0),
                               memory_space=pltpu.MemorySpace.SMEM),
        compiler_params=pltpu.CompilerParams(
            dimension_semantics=("parallel",),      # lets v7x shard the batch axis
            vmem_limit_bytes=48 * 1024 * 1024),
    )(y_pred, labels_2d)

    # Mean over the batch: /N hoisted out of the kernel as one multiply.
    return jnp.sum(partial) * (1.0 / n)


def _reference(y_pred, y_true, eta=0.1):
    n, c = y_pred.shape
    onehot = jax.nn.one_hot(y_true, c, dtype=jnp.float32)
    soft = onehot * (1.0 - eta) + eta / c
    log_p = jax.nn.log_softmax(y_pred.astype(jnp.float32), axis=-1)
    return jnp.mean(jnp.sum(-soft * log_p, axis=1))


if __name__ == "__main__":
    key = jax.random.PRNGKey(0)
    k = jax.random.split(key, 8)

    # 1) Small case: C=32 -> class dim padded to 128 lanes, single tile.
    yp = jax.random.normal(k[0], (8, 32), dtype=jnp.float32)
    yt = jax.random.randint(k[1], (8,), 0, 32, dtype=jnp.int32)
    loss = jax.block_until_ready(cross_entropy_loss_ls(yp, yt, eta=0.1))
    ref = _reference(yp, yt, eta=0.1)
    assert jnp.allclose(loss, ref, atol=1e-5, rtol=1e-5), (loss, ref)

    # 2) Larger batch, tiny C (padding path; one large tile).
    yp = jax.random.normal(k[2], (1000, 32), dtype=jnp.float32)
    yt = jax.random.randint(k[3], (1000,), 0, 32, dtype=jnp.int32)
    loss = jax.block_until_ready(cross_entropy_loss_ls(yp, yt, eta=0.1))
    ref = _reference(yp, yt, eta=0.1)
    assert jnp.allclose(loss, ref, atol=1e-5, rtol=1e-5), (loss, ref)

    # 3) Multi-tile with ragged tail (C=2048 f32 -> 432-row tiles, 3 tiles).
    yp = jax.random.normal(k[4], (1000, 2048), dtype=jnp.float32)
    yt = jax.random.randint(k[5], (1000,), 0, 2048, dtype=jnp.int32)
    loss = jax.block_until_ready(cross_entropy_loss_ls(yp, yt, eta=0.1))
    ref = _reference(yp, yt, eta=0.1)
    assert jnp.allclose(loss, ref, atol=1e-5, rtol=1e-5), (loss, ref)

    # 4) bf16 logits: elementwise path stays bf16, reductions accumulate in f32
    #    (multi-tile + ragged tail as well).
    yp = jax.random.normal(k[6], (900, 2048), dtype=jnp.float32).astype(jnp.bfloat16)
    yt = jax.random.randint(k[7], (900,), 0, 2048, dtype=jnp.int32)
    loss = jax.block_until_ready(cross_entropy_loss_ls(yp, yt, eta=0.1))
    ref = _reference(yp, yt, eta=0.1)
    assert jnp.allclose(loss, ref, atol=5e-2, rtol=2e-2), (loss, ref)

    print("KERNEL_OK")
</pallas_src>

<mosaic_0001>
module attributes {stable_mosaic.version = 11 : i64} {
  func.func @_ce_ls_kernel(%arg0: i32, %arg1: memref<8x128xf32, #tpu.memory_space<vmem>>, %arg2: memref<8x1xi32, #tpu.memory_space<vmem>>, %arg3: memref<1x1xf32, #tpu.memory_space<smem>>) attributes {dimension_semantics = [#tpu.dimension_semantics<parallel>], iteration_bounds = array<i64: 1>, scalar_prefetch = 0 : i64, scratch_operands = 0 : i64, tpu.core_type = #tpu.core_type<tc>, window_params = [{transform_indices = @transform_0, window_bounds = array<i64: 8, 128>}, {transform_indices = @transform_1, window_bounds = array<i64: 8, 1>}, {transform_indices = @transform_2, window_bounds = array<i64: 1, 1>}]} {
    %c0 = arith.constant 0 : index
    %c0_0 = arith.constant 0 : index
    %0 = vector.load %arg1[%c0, %c0_0] : memref<8x128xf32, #tpu.memory_space<vmem>>, vector<8x128xf32>
    %cst = arith.constant dense<0xFF800000> : vector<8xf32>
    %1 = vector.multi_reduction <maximumf>, %0, %cst [1] : vector<8x128xf32> to vector<8xf32>
    %2 = vector.shape_cast %1 : vector<8xf32> to vector<8x1xf32>
    %3 = vector.broadcast %2 : vector<8x1xf32> to vector<8x128xf32>
    %4 = arith.subf %0, %3 : vector<8x128xf32>
    %5 = math.exp %4 : vector<8x128xf32>
    %cst_1 = arith.constant dense<0.000000e+00> : vector<8xf32>
    %6 = vector.multi_reduction <add>, %5, %cst_1 [1] : vector<8x128xf32> to vector<8xf32>
    %7 = vector.shape_cast %6 : vector<8xf32> to vector<8x1xf32>
    %8 = math.log %7 : vector<8x1xf32>
    %9 = arith.addf %2, %8 : vector<8x1xf32>
    %c0_2 = arith.constant 0 : index
    %c0_3 = arith.constant 0 : index
    %10 = vector.load %arg2[%c0_2, %c0_3] : memref<8x1xi32, #tpu.memory_space<vmem>>, vector<8x1xi32>
    %11 = tpu.iota {dimensions = array<i32: 1>} : vector<8x128xi32>
    %12 = vector.broadcast %10 : vector<8x1xi32> to vector<8x128xi32>
    %13 = arith.cmpi eq, %11, %12 : vector<8x128xi32>
    %c0_i32 = arith.constant 0 : i32
    %14 = arith.sitofp %c0_i32 : i32 to f32
    %15 = vector.broadcast %14 : f32 to vector<8x128xf32>
    %16 = arith.select %13, %0, %15 : vector<8x128xi1>, vector<8x128xf32>
    %cst_4 = arith.constant dense<0.000000e+00> : vector<8xf32>
    %17 = vector.multi_reduction <add>, %16, %cst_4 [1] : vector<8x128xf32> to vector<8xf32>
    %18 = vector.shape_cast %17 : vector<8xf32> to vector<8x1xf32>
    %c32_i32 = arith.constant 32 : i32
    %19 = vector.broadcast %c32_i32 : i32 to vector<8x128xi32>
    %20 = arith.cmpi slt, %11, %19 : vector<8x128xi32>
    %c0_i32_5 = arith.constant 0 : i32
    %21 = arith.sitofp %c0_i32_5 : i32 to f32
    %22 = vector.broadcast %21 : f32 to vector<8x128xf32>
    %23 = arith.select %20, %0, %22 : vector<8x128xi1>, vector<8x128xf32>
    %cst_6 = arith.constant dense<0.000000e+00> : vector<8xf32>
    %24 = vector.multi_reduction <add>, %23, %cst_6 [1] : vector<8x128xf32> to vector<8xf32>
    %25 = vector.shape_cast %24 : vector<8xf32> to vector<8x1xf32>
    %cst_7 = arith.constant 0.899999976 : f32
    %26 = vector.broadcast %cst_7 : f32 to vector<8x1xf32>
    %27 = arith.mulf %26, %18 : vector<8x1xf32>
    %28 = arith.subf %9, %27 : vector<8x1xf32>
    %cst_8 = arith.constant 3.125000e-03 : f32
    %29 = vector.broadcast %cst_8 : f32 to vector<8x1xf32>
    %30 = arith.mulf %29, %25 : vector<8x1xf32>
    %31 = arith.subf %28, %30 : vector<8x1xf32>
    %c8_i32 = arith.constant 8 : i32
    %32 = arith.muli %arg0, %c8_i32 : i32
    %33 = tpu.iota {dimensions = array<i32: 0>} : vector<8x1xi32>
    %34 = vector.broadcast %32 : i32 to vector<8x1xi32>
    %35 = arith.addi %34, %33 : vector<8x1xi32>
    %c8_i32_9 = arith.constant 8 : i32
    %36 = vector.broadcast %c8_i32_9 : i32 to vector<8x1xi32>
    %37 = arith.cmpi slt, %35, %36 : vector<8x1xi32>
    %cst_10 = arith.constant 0.000000e+00 : f32
    %38 = vector.broadcast %cst_10 : f32 to vector<8x1xf32>
    %39 = arith.select %37, %31, %38 : vector<8x1xi1>, vector<8x1xf32>
    %40 = vector.shape_cast %39 : vector<8x1xf32> to vector<1x8x1xf32>
    %cst_11 = arith.constant dense<0.000000e+00> : vector<1xf32>
    %41 = vector.multi_reduction <add>, %40, %cst_11 [1, 2] : vector<1x8x1xf32> to vector<1xf32>
    %42 = vector.shape_cast %41 : vector<1xf32> to vector<1x1x1xf32>
    %43 = vector.extract %42[0, 0, 0] : f32 from vector<1x1x1xf32>
    %c0_12 = arith.constant 0 : index
    %c0_13 = arith.constant 0 : index
    %44 = memref.load %arg3[%c0_12, %c0_13] : memref<1x1xf32, #tpu.memory_space<smem>>
    memref.store %43, %arg3[%c0_12, %c0_13] : memref<1x1xf32, #tpu.memory_space<smem>>
    return
  }
  func.func @transform_0(%arg0: i32) -> (i32, i32) {
    %c0_i32 = arith.constant 0 : i32
    %c0_i32_0 = arith.constant 0 : i32
    return %arg0, %c0_i32 : i32, i32
  }
  func.func @transform_1(%arg0: i32) -> (i32, i32) {
    %c0_i32 = arith.constant 0 : i32
    %c0_i32_0 = arith.constant 0 : i32
    return %arg0, %c0_i32 : i32, i32
  }
  func.func @transform_2(%arg0: i32) -> (i32, i32) {
    %c0_i32 = arith.constant 0 : i32
    %c0_i32_0 = arith.constant 0 : i32
    return %arg0, %c0_i32 : i32, i32
  }
}

</mosaic_0001>

<bundles_post_ra>
// kernel: tpu_custom_call.1
= control target key start
LH: loop header
LB: loop body
LE: loop exit
PB: predicated region body
PF: predicated region fallthrough
CT: control target
= control target key end

     0   :  { %s119_s0 = inlined_call_operand.vmem [shape: f32[8,128], index: 0, kind: input, shape index: {}]   ;;  %s120_s1 = inlined_call_operand.vmem [shape: s32[8,1], index: 1, kind: input, shape index: {}]   ;;  %s121_s2 = inlined_call_operand.hbm [shape: f32[1,1], index: 2, kind: output, shape index: {}]  }
   0x1   :  { %v12_v0 = vld [vmem:[%s119_s0] sm:$0xff] }
   0x2   :  { %7 = vsyncpa [#allocation3], 0  ;;  %13 = vmax.xlane.f32.xlu0 %v12_v0  ;;  %v93_v1 = vmov 0   ;;  %v23_v2 = vld [vmem:[%s120_s1] sm:$0xff]  ;;  %v24_v6 = vlaneseq  ;;  %vm48_vm2 = vcmask 7168   ;;  %s94_s1 = smov [#allocation2]  }
   0x3   :  { %78 = vset.pattern.permute.xlu0 %v93_v1 }
   0x4   :  { %v25_v7 = vand.u32 127, %v24_v6 }
   0x6   :  { %vm33_vm1 = vcmp.lt.s32.totalorder %v25_v7, 32 }
   0x7   :  { %v34_v11 = vsel %vm33_vm1, %v12_v0, 0.0 }
  0x18   :  { %27 = vperm.xlu0 %78, %v23_v2  }
  0x8b   :  { %v14_v3 = vpop.xlane.xlu0 %13 }
  0x8c   :  { %v15_v4 = vsub.f32 %v12_v0, %v14_v3 }
  0x8e   :  { %v16_v5 = vmul.f32 1.442695, %v15_v4 }
  0x90   :  { %79 = vpow2.f32 %v16_v5 }
  0x93   :  { %v28_v8 = vpop.permute.xlu0 %27 }
  0x94   :  { %vm29_vm0 = vcmp.eq.s32.totalorder %v25_v7, %v28_v8 }
  0x95   :  { %v30_v10 = vsel %vm29_vm0, %v12_v0, 0.0 }
  0x9d   :  { %v80_v9 = vpop.eup %79 }
  0x9e   :  { %18 = vadd.xlane.f32.xlu1 %v80_v9 }
  0xa2   :  { %31 = vadd.xlane.f32.xlu1 %v30_v10 }
  0xa6   :  { %35 = vadd.xlane.f32.xlu1 %v34_v11 }
 0x127   :  { %v19_v12 = vpop.xlane.xlu1 %18 }
 0x128   :  { %81 = vlog2.f32 %v19_v12 }
 0x12b   :  { %v32_v13 = vpop.xlane.xlu1 %31 }
 0x12c   :  { %v37_v18 = vmul.f32 0.9, %v32_v13 }
 0x12f   :  { %v36_v15 = vpop.xlane.xlu1 %35 }
 0x130   :  { %v39_v19 = vmul.f32 0.003125, %v36_v15 }
 0x135   :  { %v82_v14 = vpop.eup %81 }
 0x136   :  { %v21_v16 = vmul.f32 0.6931472, %v82_v14 }
 0x138   :  { %v22_v17 = vadd.f32 %v21_v16, %v14_v3 }
 0x13a   :  { %v38_v20 = vsub.f32 %v22_v17, %v37_v18 }
 0x13c   :  { %v40_v21 = vsub.f32 %v38_v20, %v39_v19 }
 0x13e   :  { %v49_v22 = vsel %vm48_vm2, %v40_v21, 0.0 }
 0x13f   :  { %50 = vadd.xlane.f32.xlu1 %v49_v22 }
 0x1c8   :  { %v51_v23 = vpop.xlane.xlu1 %50 }
 0x1c9   :  { %v52_v24 = vrot.slane %v51_v23, 4 }
 0x1cb   :  { %v53_v25 = vadd.f32 %v52_v24, %v51_v23 }
 0x1cd   :  { %v54_v26 = vrot.slane %v53_v25, 2 }
 0x1cf   :  { %v55_v27 = vadd.f32 %v54_v26, %v53_v25 }
 0x1d1   :  { %v56_v28 = vrot.slane %v55_v27, 1 }
 0x1d3   :  { %v57_v29 = vadd.f32 %v56_v28, %v55_v27 }
 0x1d5   :  { %74 = vpush %v57_v29 }
 0x206   :  { %s75_s0 = spop %74 }
 0x207   :  { %60 = sst [smem:[#allocation2]] %s75_s0 }
 0x208   :  { %68 = dma.smem_to_hbm %s94_s1, 16, %s121_s2, [#allocation3]  }
 0x209   :  { %91 = dma.done.wait [#allocation3], 16  }
 0x20a   :  { %92 = vsyncadd [#allocation3], 4294967280 }
 0x20b   :  { %72 = sfence }
 0x20c   :  { %73 = vsyncpa [#allocation3], 1 }

</bundles_post_ra>
